<compile_context>
chip_gen: v6e
topology: v6e:2x2x1
jax: 0.10.0
libtpu: 0.0.40
codegen_flags: <defaults>
</compile_context>

<pallas_src>
import functools

import jax
import jax.numpy as jnp
from jax.experimental import pallas as pl
from jax.experimental.pallas import tpu as pltpu


_LANE = 128
_MIB = 1024 * 1024
_VMEM_LIMIT_FLOOR = 32 * _MIB          # v5e scoped default is only 16 MiB
_FUSED_CHUNK_TARGET = 4 * _MIB          # per-chunk f32 working-set target


def _round_up(x, m):
    return ((x + m - 1) // m) * m


def _vmem_capacity_bytes():
    """Physical per-core VMEM; conservative (v7x-safe) fallback if unknown."""
    try:
        cap = int(pltpu.get_tpu_info().vmem_capacity_bytes)
        if cap > 0:
            return cap
    except Exception:
        pass
    return 64 * _MIB


def _budgets():
    cap = _vmem_capacity_bytes()
    if cap >= 96 * _MIB:   # v5e / v6e: 128 MiB physical VMEM
        return dict(whole_slab=88 * _MIB, tile=64 * _MIB, limit_cap=100 * _MIB)
    # v7x (64 MiB physical VMEM per TensorCore) or unknown
    return dict(whole_slab=40 * _MIB, tile=36 * _MIB, limit_cap=48 * _MIB)


def _vmem_limit(need_bytes, limit_cap):
    return int(min(max(need_bytes + 4 * _MIB, _VMEM_LIMIT_FLOOR), limit_cap))


def _choose_c_chunk(C, HW, dbytes):
    """Channel-group size for the fused kernel's chunked phases."""
    sub = {4: 8, 2: 16, 1: 32}.get(dbytes, 8)   # sublane packing per dtype
    c = (_FUSED_CHUNK_TARGET // max(1, HW * 4)) // sub * sub
    c = max(sub, c)
    return int(min(C, c))


# -----------------------------------------------------------------------------
# Path 1: fused whole-slab kernel (one (C, HW) slab per batch element).
# -----------------------------------------------------------------------------
def _pfaam_fused_kernel(x_ref, o_ref, *, inv_c, inv_hw, c_chunk, gate_f32):
    C, HW = x_ref.shape
    gate_dt = jnp.float32 if gate_f32 else x_ref.dtype

    chunks = []
    lo = 0
    while lo < C:
        sz = min(c_chunk, C - lo)
        chunks.append((lo, sz))
        lo += sz

    # Phase 1: accumulate both means in f32, chunked over channel groups so no
    # full-slab f32 temporary is materialized (VMEM footprint stays ~2x slab).
    sp_acc = jnp.zeros((1, HW), jnp.float32)
    ch_sums = []
    for lo, sz in chunks:
        xs = x_ref[lo:lo + sz, :]                                         # (sz, HW)
        sp_acc = sp_acc + jnp.sum(xs, axis=0, keepdims=True, dtype=jnp.float32)
        ch_sums.append(jnp.sum(xs, axis=1, keepdims=True, dtype=jnp.float32))
    a_sp = (sp_acc * inv_c).astype(gate_dt)                               # (1, HW)

    # Phase 2: sigmoid gate + multiply, chunked (per-chunk temporaries only).
    for (lo, sz), csum in zip(chunks, ch_sums):
        a_ch = (csum * inv_hw).astype(gate_dt)                            # (sz, 1)
        xs = x_ref[lo:lo + sz, :]
        attn = jax.nn.sigmoid(a_sp * a_ch)                                # (sz, HW)
        o_ref[lo:lo + sz, :] = (attn * xs.astype(gate_dt)).astype(o_ref.dtype)


# -----------------------------------------------------------------------------
# Path 2: two-pass HW-tiled kernels for slabs that do not fit VMEM.
# -----------------------------------------------------------------------------
def _pfaam_stats_kernel(x_ref, sp_ref, ch_ref, *, inv_c, inv_hw, hw, tile, mask_tail):
    # grid = (B, n_t); t (reduction over HW for a_ch) is innermost / "arbitrary".
    t = pl.program_id(1)
    x = x_ref[...]                                                        # (C, tile)
    if mask_tail:
        # The tail tile extends past HW; those elements are undefined -> mask.
        lane = jax.lax.broadcasted_iota(jnp.int32, x.shape, dimension=1)
        x = jnp.where(t * tile + lane < hw, x, jnp.zeros_like(x))

    # Channel mean per spatial position (independent per HW tile).
    sp_ref[...] = jnp.sum(x, axis=0, keepdims=True, dtype=jnp.float32) * inv_c
    # Spatial sum per channel, accumulated into the resident output block.
    csum = jnp.sum(x, axis=1, keepdims=True, dtype=jnp.float32)           # (C, 1)

    @pl.when(t == 0)
    def _():
        ch_ref[...] = jnp.zeros_like(ch_ref)

    ch_ref[...] += csum

    @pl.when(t == pl.num_programs(1) - 1)
    def _():
        ch_ref[...] = ch_ref[...] * inv_hw


def _pfaam_apply_kernel(x_ref, sp_ref, ch_ref, o_ref, *, gate_f32):
    gate_dt = jnp.float32 if gate_f32 else x_ref.dtype
    x = x_ref[...]                                                        # (C, tile)
    attn = jax.nn.sigmoid(sp_ref[...].astype(gate_dt) * ch_ref[...].astype(gate_dt))
    o_ref[...] = (attn * x.astype(gate_dt)).astype(o_ref.dtype)


def _choose_hw_tiles(C, HW, dbytes, tile_budget):
    cands = (8192, 4096, 2048, 1024, 512, 256, 128)
    hw_cap = max(_LANE, _round_up(HW, _LANE))
    tile1 = tile2 = 128
    for t in cands:                                   # pass 1: no output slab
        if t > hw_cap:
            continue
        need = 3 * C * t * dbytes + C * t * 4 + 4 * t * 4
        if need <= tile_budget:
            tile1 = t
            break
    for t in cands:                                   # pass 2: in + out + f32 temps
        if t > hw_cap:
            continue
        need = 4 * C * t * dbytes + 2 * C * t * 4 + 4 * t * 4 + 8 * C * 4
        if need <= tile_budget:
            tile2 = t
            break
    # TODO(synk): add a channel-tiled fallback for extreme C where even a
    # 128-wide HW tile exceeds the VMEM budget (not expected for CNN features).
    return tile1, tile2


def pfaam(x, *, force_two_pass=False, hw_tile=None, fast_gate=False):
    """x: [B, C, H, W] (NCHW). Returns same shape/dtype.

    fast_gate=True computes the sigmoid/gating multiply in the input dtype
    (worthwhile for bf16 on v6e/v7x); default keeps the gate in exact f32.
    """
    B, C, H, W = x.shape
    HW = H * W
    dbytes = jnp.dtype(x.dtype).itemsize
    inv_c = 1.0 / C
    inv_hw = 1.0 / HW
    budgets = _budgets()

    x_flat = x.reshape(B, C, HW)          # free (contiguous collapse), no pad

    c_chunk = _choose_c_chunk(C, HW, dbytes)
    slab = C * HW * dbytes
    # double-buffered in + out slabs plus chunk-sized f32 temporaries
    fused_need = 4 * slab + 2 * HW * 4 + 3 * c_chunk * HW * 4 + C * 4
    use_fused = (not force_two_pass) and fused_need <= budgets["whole_slab"]
    # TODO(synk): on v7x with B == 1 the grid=(B,) fused path uses one of the
    # two TensorCores; benchmarking two-pass for that shape may win despite
    # the extra HBM read.

    if use_fused:
        out_flat = pl.pallas_call(
            functools.partial(_pfaam_fused_kernel, inv_c=inv_c, inv_hw=inv_hw,
                              c_chunk=c_chunk, gate_f32=not fast_gate),
            out_shape=jax.ShapeDtypeStruct((B, C, HW), x.dtype),
            grid_spec=pltpu.PrefetchScalarGridSpec(
                num_scalar_prefetch=0,
                grid=(B,),
                in_specs=[pl.BlockSpec((None, C, HW), lambda b: (b, 0, 0))],
                out_specs=pl.BlockSpec((None, C, HW), lambda b: (b, 0, 0)),
            ),
            compiler_params=pltpu.CompilerParams(
                dimension_semantics=("parallel",),
                vmem_limit_bytes=_vmem_limit(fused_need, budgets["limit_cap"])),
            cost_estimate=pl.CostEstimate(
                flops=6 * B * C * HW,
                transcendentals=B * C * HW,
                bytes_accessed=2 * B * C * HW * dbytes),
        )(x_flat)
        return out_flat.reshape(B, C, H, W)

    # ------------------------- two-pass HW-tiled path -------------------------
    if hw_tile is not None:
        assert hw_tile % _LANE == 0, "HW tile must be lane-dense (multiple of 128)"
        tile1 = tile2 = int(hw_tile)
    else:
        tile1, tile2 = _choose_hw_tiles(C, HW, dbytes, budgets["tile"])

    n_t1 = pl.cdiv(HW, tile1)
    n_t2 = pl.cdiv(HW, tile2)

    # Pass 1: per-spatial channel mean (a_sp) + per-channel spatial mean (a_ch).
    need1 = 3 * C * tile1 * dbytes + C * tile1 * 4 + 4 * tile1 * 4 + 4 * C * 4
    sp, ch = pl.pallas_call(
        functools.partial(_pfaam_stats_kernel, inv_c=inv_c, inv_hw=inv_hw,
                          hw=HW, tile=tile1, mask_tail=bool(HW % tile1)),
        out_shape=(jax.ShapeDtypeStruct((B, 1, HW), jnp.float32),
                   jax.ShapeDtypeStruct((B, C, 1), jnp.float32)),
        grid_spec=pltpu.PrefetchScalarGridSpec(
            num_scalar_prefetch=0,
            grid=(B, n_t1),
            in_specs=[pl.BlockSpec((None, C, tile1), lambda b, t: (b, 0, t))],
            out_specs=(pl.BlockSpec((None, 1, tile1), lambda b, t: (b, 0, t)),
                       pl.BlockSpec((None, C, 1), lambda b, t: (b, 0, 0))),
        ),
        compiler_params=pltpu.CompilerParams(
            dimension_semantics=("parallel", "arbitrary"),
            vmem_limit_bytes=_vmem_limit(need1, budgets["limit_cap"])),
        cost_estimate=pl.CostEstimate(
            flops=2 * B * C * HW,
            transcendentals=0,
            bytes_accessed=B * C * HW * dbytes + B * HW * 4 + B * C * 4),
    )(x_flat)

    # Pass 2: gate. Fully parallel grid (both axes) -> good dual-TC utilization.
    need2 = 4 * C * tile2 * dbytes + 2 * C * tile2 * 4 + 4 * tile2 * 4 + 8 * C * 4
    out_flat = pl.pallas_call(
        functools.partial(_pfaam_apply_kernel, gate_f32=not fast_gate),
        out_shape=jax.ShapeDtypeStruct((B, C, HW), x.dtype),
        grid_spec=pltpu.PrefetchScalarGridSpec(
            num_scalar_prefetch=0,
            grid=(B, n_t2),
            in_specs=[pl.BlockSpec((None, C, tile2), lambda b, t: (b, 0, t)),
                      pl.BlockSpec((None, 1, tile2), lambda b, t: (b, 0, t)),
                      pl.BlockSpec((None, C, 1), lambda b, t: (b, 0, 0))],
            out_specs=pl.BlockSpec((None, C, tile2), lambda b, t: (b, 0, t)),
        ),
        compiler_params=pltpu.CompilerParams(
            dimension_semantics=("parallel", "parallel"),
            vmem_limit_bytes=_vmem_limit(need2, budgets["limit_cap"])),
        cost_estimate=pl.CostEstimate(
            flops=4 * B * C * HW,
            transcendentals=B * C * HW,
            bytes_accessed=2 * B * C * HW * dbytes + B * HW * 4 + B * C * 4),
    )(x_flat, sp, ch)

    return out_flat.reshape(B, C, H, W)


def pfaam_ref(x):
    """Pure-JAX reference mirroring the PyTorch forward."""
    a_sp = jnp.mean(x, axis=1, keepdims=True)          # [B, 1, H, W]
    a_ch = jnp.mean(x, axis=(2, 3), keepdims=True)     # [B, C, 1, 1]
    return jax.nn.sigmoid(a_sp * a_ch) * x


if __name__ == "__main__":
    key = jax.random.PRNGKey(0)

    # Fused whole-slab path (the one this size actually takes).
    B, C, H, W = 2, 4, 16, 16
    x = jax.random.normal(key, (B, C, H, W), dtype=jnp.float32)
    expected = pfaam_ref(x)
    out = jax.block_until_ready(pfaam(x))
    assert out.shape == (B, C, H, W)
    assert jnp.allclose(out, expected, atol=1e-5, rtol=1e-5), "fused path mismatch"

    # Fused path with HW not a multiple of 128 (no host-side pad / crop).
    x2 = jax.random.normal(jax.random.PRNGKey(0), (2, 4, 7, 7), dtype=jnp.float32)
    out2 = jax.block_until_ready(pfaam(x2))
    assert jnp.allclose(out2, pfaam_ref(x2), atol=1e-5, rtol=1e-5), "odd-HW fused mismatch"

    # Two-pass path, forced, with a partial tail tile (HW=324, tile=256).
    x3 = jax.random.normal(jax.random.PRNGKey(0), (2, 4, 18, 18), dtype=jnp.float32)
    out3 = jax.block_until_ready(pfaam(x3, force_two_pass=True, hw_tile=256))
    assert jnp.allclose(out3, pfaam_ref(x3), atol=1e-5, rtol=1e-5), "two-pass tail mismatch"

    # Two-pass path with exact tiling (accumulator exercised across 2 HW tiles).
    out4 = jax.block_until_ready(pfaam(x, force_two_pass=True, hw_tile=128))
    assert jnp.allclose(out4, expected, atol=1e-5, rtol=1e-5), "two-pass mismatch"

    print("KERNEL_OK")
</pallas_src>

<mosaic_0001>
module attributes {stable_mosaic.version = 11 : i64} {
  func.func @_pfaam_fused_kernel(%arg0: i32, %arg1: memref<1x4x256xf32, #tpu.memory_space<vmem>>, %arg2: memref<1x4x256xf32, #tpu.memory_space<vmem>>) attributes {dimension_semantics = [#tpu.dimension_semantics<parallel>], iteration_bounds = array<i64: 2>, scalar_prefetch = 0 : i64, scratch_operands = 0 : i64, tpu.core_type = #tpu.core_type<tc>, window_params = [{transform_indices = @transform_0, window_bounds = array<i64: 1, 4, 256>}, {transform_indices = @transform_1, window_bounds = array<i64: 1, 4, 256>}]} {
    %cst = arith.constant 0.000000e+00 : f32
    %0 = vector.broadcast %cst : f32 to vector<1x256xf32>
    %c0 = arith.constant 0 : index
    %c0_0 = arith.constant 0 : index
    %c0_1 = arith.constant 0 : index
    %1 = vector.load %arg1[%c0, %c0_0, %c0_1] : memref<1x4x256xf32, #tpu.memory_space<vmem>>, vector<1x4x256xf32>
    %2 = vector.shape_cast %1 : vector<1x4x256xf32> to vector<4x256xf32>
    %cst_2 = arith.constant dense<0.000000e+00> : vector<256xf32>
    %3 = vector.multi_reduction <add>, %2, %cst_2 [0] : vector<4x256xf32> to vector<256xf32>
    %4 = vector.shape_cast %3 : vector<256xf32> to vector<1x256xf32>
    %5 = arith.addf %0, %4 : vector<1x256xf32>
    %cst_3 = arith.constant dense<0.000000e+00> : vector<4xf32>
    %6 = vector.multi_reduction <add>, %2, %cst_3 [1] : vector<4x256xf32> to vector<4xf32>
    %7 = vector.shape_cast %6 : vector<4xf32> to vector<4x1xf32>
    %cst_4 = arith.constant 2.500000e-01 : f32
    %8 = vector.broadcast %cst_4 : f32 to vector<1x256xf32>
    %9 = arith.mulf %5, %8 : vector<1x256xf32>
    %cst_5 = arith.constant 3.906250e-03 : f32
    %10 = vector.broadcast %cst_5 : f32 to vector<4x1xf32>
    %11 = arith.mulf %7, %10 : vector<4x1xf32>
    %c0_6 = arith.constant 0 : index
    %c0_7 = arith.constant 0 : index
    %c0_8 = arith.constant 0 : index
    %12 = vector.load %arg1[%c0_6, %c0_7, %c0_8] : memref<1x4x256xf32, #tpu.memory_space<vmem>>, vector<1x4x256xf32>
    %13 = vector.shape_cast %12 : vector<1x4x256xf32> to vector<4x256xf32>
    %14 = vector.broadcast %9 : vector<1x256xf32> to vector<4x256xf32>
    %15 = vector.broadcast %11 : vector<4x1xf32> to vector<4x256xf32>
    %16 = arith.mulf %14, %15 : vector<4x256xf32>
    %17 = arith.negf %16 : vector<4x256xf32>
    %18 = math.exp %17 : vector<4x256xf32>
    %cst_9 = arith.constant 1.000000e+00 : f32
    %19 = vector.broadcast %cst_9 : f32 to vector<4x256xf32>
    %20 = arith.addf %19, %18 : vector<4x256xf32>
    %21 = arith.divf %19, %20 : vector<4x256xf32>
    %22 = arith.mulf %21, %13 : vector<4x256xf32>
    %c0_10 = arith.constant 0 : index
    %c0_11 = arith.constant 0 : index
    %c0_12 = arith.constant 0 : index
    %23 = vector.load %arg2[%c0_10, %c0_11, %c0_12] : memref<1x4x256xf32, #tpu.memory_space<vmem>>, vector<1x4x256xf32>
    %24 = vector.shape_cast %23 : vector<1x4x256xf32> to vector<4x256xf32>
    %25 = vector.shape_cast %22 : vector<4x256xf32> to vector<1x4x256xf32>
    tpu.vector_store %arg2[%c0_10, %c0_11, %c0_12], %25 {strides = array<i32>} : memref<1x4x256xf32, #tpu.memory_space<vmem>>, vector<1x4x256xf32>,
    return
  }
  func.func @transform_0(%arg0: i32) -> (i32, i32, i32) {
    %c0_i32 = arith.constant 0 : i32
    %c0_i32_0 = arith.constant 0 : i32
    %c0_i32_1 = arith.constant 0 : i32
    return %arg0, %c0_i32, %c0_i32_0 : i32, i32, i32
  }
  func.func @transform_1(%arg0: i32) -> (i32, i32, i32) {
    %c0_i32 = arith.constant 0 : i32
    %c0_i32_0 = arith.constant 0 : i32
    %c0_i32_1 = arith.constant 0 : i32
    return %arg0, %c0_i32, %c0_i32_0 : i32, i32, i32
  }
}

</mosaic_0001>

<bundles_post_ra>
// kernel: tpu_custom_call.1
= control target key start
LH: loop header
LB: loop body
LE: loop exit
PB: predicated region body
PF: predicated region fallthrough
CT: control target
= control target key end

     0   :  { %6 = vsyncpa [#allocation3], 0  ;;  %s590_s0 = inlined_call_operand.hbm [shape: f32[2,4,256], index: 0, kind: input, shape index: {}]   ;;  %s591_s1 = inlined_call_operand.hbm [shape: f32[2,4,256], index: 1, kind: output, shape index: {}]  }
   0x1   :  { %8 = vsyncpa [#allocation3 + $0x1], 0 }
   0x2   :  { %9 = vsyncpa [#allocation4], 0 }
   0x3   :  { %11 = vsyncpa [#allocation4 + $0x1], 0  ;;  %s445_s6 = smov 0   ;;  %s447_s7 = smov 0  }
   0x4   :  { %s449_s8 = smov 0   ;;  %s451_s9 = smov 0  }
   0x5 LB: > { %s466_s10 = sadd.s32 4294967295, %s431_s9   ;;  %s266_s11 = sadd.s32 4294967294, %s431_s9   ;;  %s431_s9 = sphi %s451_s9, %s608_s9   ;;  %s427_s8 = sphi %s449_s8, %s607_s8   ;;  %s423_s7 = sphi %s447_s7, %s606_s7   ;;  %s419_s6 = sphi %s445_s6, %s605_s6  }
   0x6   : > { %s470_s12 = sadd.s32 1, %s431_s9   ;;  %s24_s13 = sadd.s32 1, %s427_s8 }
   0x7   : > { %s21_s14 = ssub.s32 %s431_s9, %s470_s12  ;;  %p31_p0 = scmp.ne.s32.totalorder %s427_s8, %s423_s7 }
   0x8   : > { %p22_p1 = scmp.eq.s32.totalorder %s21_s14, 0  ;;  %p32_p2 = scmp.eq.s32.totalorder %s431_s9, 0 }
   0x9   : > { %p37_p3 = scmp.ne.s32.totalorder %s423_s7, %s419_s6  ;;  %p38_p4 = scmp.eq.s32.totalorder %s466_s10, 0 }
   0xa   : > { %s482_s15 = scalar_select %p22_p1, %s427_s8, %s24_s13  }
   0xb   : > { %p484_p5 = por %p32_p2, %p31_p0  ;;  %p488_p6 = por %p38_p4, %p37_p3 }
   0xc   : > { %p61_p7 = scmp.eq.s32.totalorder %s466_s10, 1  ;;  %p67_p8 = scmp.eq.s32.totalorder %s266_s11, 1 }
   0xd   : > { %s595_s17 = scalar_select %p488_p6, 1, 0 }
   0xe   : > { %p296_p10 = scmp.lt.s32.totalorder %s431_s9, 2  ;;  %p495_p11 = por %p61_p7, %p31_p0 }
   0xf   : > { %p499_p12 = por %p67_p8, %p37_p3  ;;  %s87_s20 = sand.u32 1, %s427_s8  }
  0x10   : > { %s596_s18 = scalar_select %p495_p11, 1, 0 }
  0x11   : > { %s597_s19 = scalar_select %p499_p12, 1, 0 }
  0x12   : > { %s282_s21 = sshll.u32 %s431_s9, 7  ;;  %s269_s22 = sshll.u32 %s87_s20, 3 }
  0x13   : > { %s508_s25 = scalar_lea.hbm %s590_s0, %s282_s21  ;;  %s91_s26 = scalar_lea.vmem [#allocation2], %s269_s22 }
  0x14   : > { %s99_s27 = sshll.u32 %s91_s26, 4  ;;  %p512_p13 = pnand %p296_p10, %p484_p5  ;;  %s516_s27 = int_to_ptr.vmem [resolvable:$true] %s99_s27 }
  0x15   : > { %s88_s29 = scalar_lea.sflag [#allocation3], %s87_s20  ;;  %s339_s30 = scalar_lea.hbm %s508_s25, 128 }
  0x16   : > { %p340_p2 = scmp.ne.s32.totalorder %s508_s25, %s339_s30  ;;  %p341_p3 = pneg %p512_p13 }
  0x17   : > { %s344_s4 = scalar_lea.hbm %s590_s0, 256  ;;  %p345_p5 = scmp.lt.s32.totalorder %s508_s25, %s590_s0 }
  0x18   : > { %p342_p4 = pnand %p341_p3, %p340_p2  ;;  %p346_p8 = scmp.lt.s32.totalorder %s344_s4, %s339_s30 }
  0x1a   : > { %p343_p7 = pneg %p342_p4  ;;  %p347_p10 = por %p346_p8, %p345_p5 }
  0x1c   : > { %p348_p9 = pnand %p347_p10, %p343_p7 }
  0x1e   : > { %351 = shalt.err (!%p348_p9)
}
  0x1f   : > { %s352_s13 = scalar_lea.vmem %s516_s27, 128  ;;  %s433_s14 = smov [#allocation2]  }
  0x20   : > { %p353_p0 = scmp.ne.s32.totalorder %s516_s27, %s352_s13  ;;  %s357_s16 = sshll.u32 %s433_s14, 4  ;;  %s358_s16 = int_to_ptr.vmem [resolvable:$false] %s357_s16 }
  0x21   : > { %s359_s20 = scalar_lea.vmem %s358_s16, 256  ;;  %p360_p4 = scmp.lt.s32.totalorder %s516_s27, %s358_s16 }
  0x22   : > { %p355_p1 = pnand %p353_p0, %p341_p3  ;;  %p361_p12 = scmp.lt.s32.totalorder %s359_s20, %s352_s13 }
  0x24   : > { %p356_p2 = pneg %p355_p1  ;;  %p362_p11 = por %p361_p12, %p360_p4 }
  0x26   : > { %p363_p6 = pnand %p362_p11, %p356_p2 }
  0x28   : > { %366 = shalt.err (!%p363_p6)
}
  0x29   : > { %291 = dma.hbm_to_vmem [thread:$0]  (!%p512_p13), %s508_s25, 128, %s516_s27, %s88_s29  }
  0x2a   : > { %p599_p9 = scmp.lt.s32.totalorder %s431_s9, 3  ;;  %p600_p7 = scmp.ge.s32.totalorder %s431_s9, 1 }
  0x2c   : > { %p105_p0 = pnand %p600_p7, %p599_p9 }
  0x2d   : > { %s543_s21 = sand.u32 (!%p105_p0), 1, %s423_s7   ;;  %p601_p6 = scmp.ne.s32.totalorder (!%p105_p0), %s595_s17, 0 }
  0x2e   : > { %108 = sbr.rel (%p105_p0) target bundleno = 250 (0xfa), region = 24  ;;  %s273_s22 = sshll.u32 (!%p105_p0), %s543_s21, 3 }
  0x2f   : > { %s111_s23 = scalar_lea.sflag (!%p105_p0), [#allocation3], %s543_s21  ;;  %s114_s24 = scalar_lea.vmem (!%p105_p0), [#allocation2], %s273_s22 }
  0x33   : > { %410 = dma.done.wait (%p601_p6), %s111_s23, 128  }
  0x34   : > { %412 = vsyncadd (%p601_p6), %s111_s23, 4294967168  ;;  %vm137_vm0 = vcmask 1043456   ;;  %v133_v0 = vld [vmem:[%s114_s24] sm:$0xff]  ;;  %s283_s17 = sshll.u32 %s466_s10, 7  ;;  %s132_s25 = scalar_lea.vmem [#allocation5], %s273_s22 }
  0x35   : > { %v135_v1 = vcombine.high %v133_v0, %v133_v0  ;;  %v138_v2 = vsel %vm137_vm0, %v133_v0, 0.0  ;;  %s196_s26 = sshll.u32 %s132_s25, 4  ;;  %s194_s29 = scalar_lea.hbm %s591_s1, %s283_s17  ;;  %s197_s26 = int_to_ptr.vmem [resolvable:$true] %s196_s26 }
  0x36   : > { %v139_v5 = vrot.slane %v138_v2, 4  ;;  %s182_s30 = scalar_lea.sflag [#allocation4], %s543_s21  ;;  %s367_s2 = scalar_lea.vmem %s197_s26, 128 }
  0x37   : > { %v145_v3 = vsel %vm137_vm0, %v135_v1, 0.0  ;;  %p368_p11 = scmp.ne.s32.totalorder %s197_s26, %s367_s2  ;;  %p602_p12 = scmp.ne.s32.totalorder %s596_s18, 0 }
  0x38   : > { %v154_v4 = vadd.f32 %v145_v3, %v138_v2  ;;  %v146_v6 = vrot.slane %v145_v3, 4  ;;  %v140_v7 = vadd.f32 %v139_v5, %v138_v2  ;;  %s434_s3 = smov [#allocation5]  }
  0x39   : > { %p369_p13 = pnand %p368_p11, %p602_p12  ;;  %s371_s4 = sshll.u32 %s434_s3, 4  ;;  %s372_s4 = int_to_ptr.vmem [resolvable:$false] %s371_s4 }
  0x3a   : > { %155 = vadd.xlane.f32.xlu0 %v154_v4  ;;  %v147_v8 = vadd.f32 %v146_v6, %v145_v3  ;;  %v141_v9 = vrot.slane %v140_v7, 2  ;;  %s373_s10 = scalar_lea.vmem %s372_s4, 256  ;;  %p374_p3 = scmp.lt.s32.totalorder %s197_s26, %s372_s4 }
  0x3b   : > { %p370_p1 = pneg %p369_p13  ;;  %p375_p5 = scmp.lt.s32.totalorder %s373_s10, %s367_s2 }
  0x3c   : > { %v148_v10 = vrot.slane %v147_v8, 2  ;;  %v142_v11 = vadd.f32 %v141_v9, %v140_v7 }
  0x3d   : > { %p376_p8 = por %p375_p5, %p374_p3 }
  0x3e   : > { %v149_v12 = vadd.f32 %v148_v10, %v147_v8  ;;  %v143_v13 = vrot.slane %v142_v11, 1 }
  0x3f   : > { %p377_p10 = pnand %p376_p8, %p370_p1 }
  0x40   : > { %v150_v14 = vrot.slane %v149_v12, 1  ;;  %v144_v15 = vadd.f32 %v143_v13, %v142_v11 }
  0x42   : > { %v151_v16 = vadd.f32 %v150_v14, %v149_v12  ;;  %v157_v17 = vmul.f32 0.25, %v144_v15 }
  0x44   : > { %v158_v18 = vmul.f32 0.25, %v151_v16 }
  0xc3   : > { %v156_v19 = vpop.xlane.xlu0 %155 }
  0xc4   : > { %v159_v20 = vmul.f32 0.00390625, %v156_v19 }
  0xc6   : > { %v160_v21 = vmul.f32 %v159_v20, %v157_v17  ;;  %v161_v22 = vmul.f32 %v159_v20, %v158_v18 }
  0xc8   : > { %v275_v23 = vmul.f32 -1.442695, %v160_v21  ;;  %v276_v24 = vmul.f32 -1.442695, %v161_v22 }
  0xca   : > { %331 = vpow2.f32 %v275_v23 }
  0xcb   : > { %333 = vpow2.f32 %v276_v24 }
  0xd7   : > { %v332_v25 = vpop.eup %331 }
  0xd8   : > { %v334_v26 = vpop.eup %333  ;;  %v168_v27 = vadd.f32 1.0, %v332_v25 }
  0xd9   : > { %v169_v28 = vadd.f32 1.0, %v334_v26 }
  0xda   : > { %335 = vrcp.f32 %v168_v27 }
  0xdb   : > { %337 = vrcp.f32 %v169_v28 }
  0xe7   : > { %v336_v29 = vpop.eup %335 }
  0xe8   : > { %v338_v30 = vpop.eup %337  ;;  %v174_v31 = vmul.f32 %v336_v29, %v133_v0 }
  0xe9   : > { %v175_v32 = vmul.f32 %v338_v30, %v135_v1 }
  0xeb   : > { %v178_v33 = vcombine.low %v174_v31, %v175_v32 }
  0xed   : > { %180 = vst [vmem:[%s132_s25] sm:$0xff] %v178_v33 }
  0xee   : > { %380 = shalt.err (!%p377_p10)
}
  0xef   : > { %s381_s5 = scalar_lea.hbm %s194_s29, 128  ;;  %s385_s14 = scalar_lea.hbm %s591_s1, 256 }
  0xf0   : > { %p382_p2 = scmp.ne.s32.totalorder %s194_s29, %s381_s5  ;;  %p386_p7 = scmp.lt.s32.totalorder %s194_s29, %s591_s1 }
  0xf1   : > { %p387_p0 = scmp.lt.s32.totalorder %s385_s14, %s381_s5 }
  0xf2   : > { %p383_p4 = pnand %p382_p2, %p602_p12 }
  0xf3   : > { %p388_p6 = por %p387_p0, %p386_p7 }
  0xf4   : > { %p384_p9 = pneg %p383_p4 }
  0xf6   : > { %p389_p11 = pnand %p388_p6, %p384_p9 }
  0xf8   : > { %392 = shalt.err (!%p389_p11)
}
  0xf9   : > { %286 = dma.vmem_to_hbm [thread:$0]  (%p602_p12), %s197_s26, 128, %s194_s29, %s182_s30  }
  0xfa PF: > { %s208_s21 = sand.u32 1, %s419_s6   ;;  %p603_p13 = scmp.ne.s32.totalorder %s597_s19, 0 }
  0xfb   : > { %p604_p1 = scmp.ge.s32.totalorder %s431_s9, 2  ;;  %s209_s22 = scalar_lea.sflag [#allocation4], %s208_s21 }
  0xfd   : > { %p293_p3 = pnand %p604_p1, %p603_p13 }
  0xff   : > { %p294_p5 = pneg %p293_p3 }
 0x101   : > { %414 = dma.done.wait (%p294_p5), %s209_s22, 128  }
 0x102   : > { %416 = vsyncadd (%p294_p5), %s209_s22, 4294967168  ;;  %p14_p8 = scmp.ge.s32.totalorder %s470_s12, 4   ;;  %s605_s6 = smov %s423_s7 }
 0x103   : > { %s606_s7 = smov %s427_s8  ;;  %s607_s8 = smov %s482_s15 }
 0x104   : > { %s608_s9 = smov %s470_s12  ;;  %16 = sbr.rel (!%p14_p8) target bundleno = 5 (0x5), region = 69 }
 0x109   :  { %214 = vsyncpa [#allocation3], 1 }
 0x10a   :  { %216 = vsyncpa [#allocation3 + $0x1], 1 }
 0x10b   :  { %217 = vsyncpa [#allocation4], 1 }
 0x10c   :  { %219 = vsyncpa [#allocation4 + $0x1], 1 }

</bundles_post_ra>
